<compile_context>
chip_gen: v7x
topology: tpu7x:2x2x1
jax: 0.10.0
libtpu: 0.0.40
codegen_flags: <defaults>
</compile_context>

<pallas_src>
import functools

import jax
import jax.numpy as jnp
from jax.experimental import pallas as pl
from jax.experimental.pallas import tpu as pltpu


def _make_kernel(C, C8, TJ, matmul_dtype=None):
    ctot = 2 * C8 + C

    def cast(v):
        return v if matmul_dtype is None else v.astype(matmul_dtype)

    def kernel(x_ref, w_ref, b_ref, gamma_ref, out_ref, proj_ref, acc_ref):
        j = pl.program_id(1)
        nj = pl.num_programs(1)

        # Once per batch: fused projection  [f; g; h] = W_cat @ x + b_cat  -> (Ctot, N)
        @pl.when(j == 0)
        def _init():
            x = x_ref[0]                                                   # (C, N)
            proj_ref[...] = (
                jnp.dot(cast(w_ref[...]), cast(x),
                        preferred_element_type=jnp.float32)
                + b_ref[...])
            acc_ref[...] = jnp.zeros_like(acc_ref)

        off = pl.multiple_of(j * TJ, TJ)
        f_blk = proj_ref[0:C8, pl.ds(off, TJ)]                             # (C8, TJ)
        g_all = proj_ref[C8:2 * C8, :]                                     # (C8, N)
        h_blk = proj_ref[2 * C8:ctot, pl.ds(off, TJ)]                      # (C,  TJ)

        # Block of rows of f^T @ g:  s[jq, i] = sum_k f[k, jq] * g[k, i]   (no transpose)
        s = jax.lax.dot_general(
            cast(f_blk), cast(g_all), (((0,), (0,)), ((), ())),
            preferred_element_type=jnp.float32)                            # (TJ, N)

        # Row softmax (softmax axis fully resident in this block), fp32 stats.
        m = jnp.max(s, axis=-1, keepdims=True)
        e = jnp.exp(s - m)
        denom = jnp.sum(e, axis=-1, keepdims=True)
        attn = e * pl.reciprocal(denom, approx=False)                      # (TJ, N)

        # sa[c, i] += sum_{jq in block} h[c, jq] * attn[jq, i]
        acc_ref[...] += jnp.dot(cast(h_blk), cast(attn),
                                preferred_element_type=jnp.float32)

        @pl.when(j == nj - 1)
        def _finalize():
            x = x_ref[0]                                                   # (C, N)
            out_ref[0] = (gamma_ref[0] * acc_ref[...] + x).astype(out_ref.dtype)

    return kernel


def self_attention(x_nchw, params, tj=None, matmul_dtype=None):
    """x_nchw: (B, C, W, H) — matches the PyTorch module's input layout.

    Set matmul_dtype=jnp.bfloat16 on v6e/v7x for ~2x MXU throughput (fp32 accumulation
    is preserved); default fp32 keeps bit-level-tight agreement with the reference.
    """
    B, C, W, H = x_nchw.shape
    N = W * H
    wf, wg, wh = params["wf"], params["wg"], params["wh"]
    C8 = wf.shape[0]
    ctot = 2 * C8 + C

    if tj is None:
        tj = next((t for t in (512, 256, 128) if N % t == 0), N)
    assert N % tj == 0, f"tile {tj} must divide N={N}"

    # Channel-first, lane-dense over N: no wrapper transposes needed.
    x_cn = x_nchw.reshape(B, C, N)
    w_cat = jnp.concatenate([wf, wg, wh], axis=0)                          # (Ctot, C)
    b_cat = jnp.concatenate(
        [params["bf"], params["bg"], params["bh"]], axis=0).reshape(ctot, 1)
    gamma = params["gamma"].reshape(1).astype(jnp.float32)

    # Explicit VMEM budget: x/out (double-buffered) + proj + accumulator + score block.
    est = 4 * (4 * C * N + C * N + ctot * N + 3 * tj * N + 2 * (ctot * C + ctot))
    vmem_limit = int(min(max(2 * est, 16 * 1024 * 1024), 64 * 1024 * 1024))

    # TODO(synk): on v7x, odd B leaves one TensorCore idle; splitting the output (i) axis
    # as an extra parallel grid dim would need a two-pass softmax and is not done here.
    out_cn = pl.pallas_call(
        _make_kernel(C, C8, tj, matmul_dtype),
        out_shape=jax.ShapeDtypeStruct((B, C, N), x_cn.dtype),
        grid_spec=pltpu.PrefetchScalarGridSpec(
            num_scalar_prefetch=0,
            grid=(B, N // tj),
            in_specs=[
                pl.BlockSpec((1, C, N), lambda b, j: (b, 0, 0)),        # x (per-batch, resident)
                pl.BlockSpec((ctot, C), lambda b, j: (0, 0)),           # fused Wf|Wg|Wh
                pl.BlockSpec((ctot, 1), lambda b, j: (0, 0)),           # fused biases
                pl.BlockSpec(memory_space=pltpu.MemorySpace.SMEM),      # gamma scalar
            ],
            out_specs=pl.BlockSpec((1, C, N), lambda b, j: (b, 0, 0)),
            scratch_shapes=[
                pltpu.VMEM((ctot, N), jnp.float32),   # fused projection [f; g; h]
                pltpu.VMEM((C, N), jnp.float32),      # sa accumulator
            ],
        ),
        compiler_params=pltpu.CompilerParams(
            dimension_semantics=("parallel", "arbitrary"),
            vmem_limit_bytes=vmem_limit,
        ),
    )(x_cn, w_cat, b_cat, gamma)

    return out_cn.reshape(B, C, W, H)


def init_params(key, in_dim):
    """Mirror the PyTorch init: xavier_uniform_ on 1x1 conv weights, zero biases, gamma=0.
    Weights stored as (out_ch, in_ch), i.e. the squeezed conv kernel."""
    C = in_dim
    C8 = C // 8

    def xavier_conv(k, out_ch, in_ch):
        bound = (6.0 / (in_ch + out_ch)) ** 0.5
        return jax.random.uniform(k, (out_ch, in_ch), jnp.float32, -bound, bound)

    kf, kg, kh = jax.random.split(key, 3)
    return {
        "wf": xavier_conv(kf, C8, C), "bf": jnp.zeros((C8,), jnp.float32),
        "wg": xavier_conv(kg, C8, C), "bg": jnp.zeros((C8,), jnp.float32),
        "wh": xavier_conv(kh, C, C),  "bh": jnp.zeros((C,), jnp.float32),
        "gamma": jnp.zeros((1,), jnp.float32),
    }


def _reference(x_nchw, params):
    """Plain-JAX reference of the exact PyTorch semantics (for verification)."""
    B, C, W, H = x_nchw.shape
    N = W * H
    x_cn = x_nchw.reshape(B, C, N)
    f = jnp.einsum("oc,bcn->bon", params["wf"], x_cn) + params["bf"][None, :, None]
    g = jnp.einsum("oc,bcn->bon", params["wg"], x_cn) + params["bg"][None, :, None]
    h = jnp.einsum("oc,bcn->bon", params["wh"], x_cn) + params["bh"][None, :, None]
    s = jnp.einsum("bki,bkj->bij", f, g)                      # f^T @ g
    attn = jax.nn.softmax(s, axis=-1)
    sa = jnp.einsum("bcj,bji->bci", h, attn)                  # h @ attention
    out = params["gamma"][0] * sa + x_cn
    return out.reshape(B, C, W, H)


if __name__ == "__main__":
    key = jax.random.PRNGKey(0)
    k_x, k_p = jax.random.split(key)

    B, C, W, H = 2, 32, 16, 16            # N = 256; tj=128 exercises the 2-step j accumulation
    x = jax.random.normal(k_x, (B, C, W, H), jnp.float32)
    params = init_params(k_p, C)
    # The module initialises gamma to 0 (out == x); use a nonzero gamma here so the
    # attention path is actually exercised and verified against the reference.
    params["gamma"] = jnp.full((1,), 0.5, jnp.float32)

    out = jax.block_until_ready(self_attention(x, params, tj=128))
    ref = jax.block_until_ready(_reference(x, params))

    assert out.shape == (B, C, W, H)
    err = float(jnp.max(jnp.abs(out - ref)))
    assert jnp.allclose(out, ref, atol=1e-4, rtol=1e-4), f"max abs err = {err}"
    print("KERNEL_OK")
</pallas_src>

<mosaic_0001>
module attributes {stable_mosaic.version = 11 : i64} {
  func.func @kernel(%arg0: i32, %arg1: i32, %arg2: memref<1x32x256xf32, #tpu.memory_space<vmem>>, %arg3: memref<40x32xf32, #tpu.memory_space<vmem>>, %arg4: memref<40x1xf32, #tpu.memory_space<vmem>>, %arg5: memref<1xf32, #tpu.memory_space<smem>>, %arg6: memref<1x32x256xf32, #tpu.memory_space<vmem>>, %arg7: memref<40x256xf32, #tpu.memory_space<vmem>>, %arg8: memref<32x256xf32, #tpu.memory_space<vmem>>) attributes {dimension_semantics = [#tpu.dimension_semantics<parallel>, #tpu.dimension_semantics<arbitrary>], iteration_bounds = array<i64: 2, 2>, scalar_prefetch = 0 : i64, scratch_operands = 2 : i64, tpu.core_type = #tpu.core_type<tc>, window_params = [{transform_indices = @transform_0, window_bounds = array<i64: 1, 32, 256>}, {pipeline_mode = #tpu.pipeline_mode<synchronous>, transform_indices = @transform_1, window_bounds = array<i64: 40, 32>}, {pipeline_mode = #tpu.pipeline_mode<synchronous>, transform_indices = @transform_2, window_bounds = array<i64: 40, 1>}, {transform_indices = @transform_3, window_bounds = array<i64: 1>}, {transform_indices = @transform_4, window_bounds = array<i64: 1, 32, 256>}]} {
    %c0_i32 = arith.constant 0 : i32
    %0 = arith.cmpi eq, %arg1, %c0_i32 : i32
    %1 = arith.extui %0 : i1 to i32
    %c0_i32_0 = arith.constant 0 : i32
    %2 = arith.cmpi ne, %1, %c0_i32_0 : i32
    scf.if %2 {
      %c0_10 = arith.constant 0 : index
      %c0_11 = arith.constant 0 : index
      %c0_12 = arith.constant 0 : index
      %28 = vector.load %arg2[%c0_10, %c0_11, %c0_12] : memref<1x32x256xf32, #tpu.memory_space<vmem>>, vector<1x32x256xf32>
      %29 = vector.shape_cast %28 : vector<1x32x256xf32> to vector<32x256xf32>
      %c0_13 = arith.constant 0 : index
      %c0_14 = arith.constant 0 : index
      %30 = vector.load %arg3[%c0_13, %c0_14] : memref<40x32xf32, #tpu.memory_space<vmem>>, vector<40x32xf32>
      %cst_15 = arith.constant dense<0.000000e+00> : vector<40x256xf32>
      %31 = tpu.matmul %30, %29, %cst_15 {dimension_numbers = #tpu.dot_dimension_numbers<[1], [0], [0], [1], [0, 0, 1, 1], [], []>} : vector<40x32xf32>, vector<32x256xf32>, vector<40x256xf32> -> vector<40x256xf32>
      %c0_16 = arith.constant 0 : index
      %c0_17 = arith.constant 0 : index
      %32 = vector.load %arg4[%c0_16, %c0_17] : memref<40x1xf32, #tpu.memory_space<vmem>>, vector<40x1xf32>
      %33 = vector.broadcast %32 : vector<40x1xf32> to vector<40x256xf32>
      %34 = arith.addf %31, %33 : vector<40x256xf32>
      %c0_18 = arith.constant 0 : index
      %c0_19 = arith.constant 0 : index
      %35 = vector.load %arg7[%c0_18, %c0_19] : memref<40x256xf32, #tpu.memory_space<vmem>>, vector<40x256xf32>
      tpu.vector_store %arg7[%c0_18, %c0_19], %34 {strides = array<i32>} : memref<40x256xf32, #tpu.memory_space<vmem>>, vector<40x256xf32>,
      %cst_20 = arith.constant 0.000000e+00 : f32
      %36 = vector.broadcast %cst_20 : f32 to vector<32x256xf32>
      %c0_21 = arith.constant 0 : index
      %c0_22 = arith.constant 0 : index
      %37 = vector.load %arg8[%c0_21, %c0_22] : memref<32x256xf32, #tpu.memory_space<vmem>>, vector<32x256xf32>
      tpu.vector_store %arg8[%c0_21, %c0_22], %36 {strides = array<i32>} : memref<32x256xf32, #tpu.memory_space<vmem>>, vector<32x256xf32>,
    } else {
    }
    %c128_i32 = arith.constant 128 : i32
    %3 = arith.muli %arg1, %c128_i32 : i32
    %4 = tpu.assume_multiple %3, 128 : i32
    %c0 = arith.constant 0 : index
    %5 = arith.index_cast %4 : i32 to index
    %6 = vector.load %arg7[%c0, %5] : memref<40x256xf32, #tpu.memory_space<vmem>>, vector<4x128xf32>
    %c4 = arith.constant 4 : index
    %c0_1 = arith.constant 0 : index
    %7 = vector.load %arg7[%c4, %c0_1] : memref<40x256xf32, #tpu.memory_space<vmem>>, vector<4x256xf32>
    %c8 = arith.constant 8 : index
    %8 = arith.index_cast %4 : i32 to index
    %9 = vector.load %arg7[%c8, %8] : memref<40x256xf32, #tpu.memory_space<vmem>>, vector<32x128xf32>
    %cst = arith.constant dense<0.000000e+00> : vector<128x256xf32>
    %10 = tpu.matmul %6, %7, %cst {dimension_numbers = #tpu.dot_dimension_numbers<[0], [0], [1], [1], [0, 1, 1, 1], [], []>} : vector<4x128xf32>, vector<4x256xf32>, vector<128x256xf32> -> vector<128x256xf32>
    %cst_2 = arith.constant dense<0xFF800000> : vector<128xf32>
    %11 = vector.multi_reduction <maximumf>, %10, %cst_2 [1] : vector<128x256xf32> to vector<128xf32>
    %12 = vector.shape_cast %11 : vector<128xf32> to vector<128x1xf32>
    %13 = vector.broadcast %12 : vector<128x1xf32> to vector<128x256xf32>
    %14 = arith.subf %10, %13 : vector<128x256xf32>
    %15 = math.exp %14 : vector<128x256xf32>
    %cst_3 = arith.constant dense<0.000000e+00> : vector<128xf32>
    %16 = vector.multi_reduction <add>, %15, %cst_3 [1] : vector<128x256xf32> to vector<128xf32>
    %17 = vector.shape_cast %16 : vector<128xf32> to vector<128x1xf32>
    %18 = tpu.reciprocal %17 : vector<128x1xf32> -> vector<128x1xf32>
    %19 = vector.broadcast %18 : vector<128x1xf32> to vector<128x256xf32>
    %20 = arith.mulf %15, %19 : vector<128x256xf32>
    %c0_4 = arith.constant 0 : index
    %c0_5 = arith.constant 0 : index
    %21 = vector.load %arg8[%c0_4, %c0_5] : memref<32x256xf32, #tpu.memory_space<vmem>>, vector<32x256xf32>
    %cst_6 = arith.constant dense<0.000000e+00> : vector<32x256xf32>
    %22 = tpu.matmul %9, %20, %cst_6 {dimension_numbers = #tpu.dot_dimension_numbers<[1], [0], [0], [1], [0, 0, 1, 1], [], []>} : vector<32x128xf32>, vector<128x256xf32>, vector<32x256xf32> -> vector<32x256xf32>
    %23 = arith.addf %21, %22 : vector<32x256xf32>
    %c0_7 = arith.constant 0 : index
    %c0_8 = arith.constant 0 : index
    %24 = vector.load %arg8[%c0_7, %c0_8] : memref<32x256xf32, #tpu.memory_space<vmem>>, vector<32x256xf32>
    tpu.vector_store %arg8[%c0_7, %c0_8], %23 {strides = array<i32>} : memref<32x256xf32, #tpu.memory_space<vmem>>, vector<32x256xf32>,
    %c1_i32 = arith.constant 1 : i32
    %25 = arith.cmpi eq, %arg1, %c1_i32 : i32
    %26 = arith.extui %25 : i1 to i32
    %c0_i32_9 = arith.constant 0 : i32
    %27 = arith.cmpi ne, %26, %c0_i32_9 : i32
    scf.if %27 {
      %c0_10 = arith.constant 0 : index
      %c0_11 = arith.constant 0 : index
      %c0_12 = arith.constant 0 : index
      %28 = vector.load %arg2[%c0_10, %c0_11, %c0_12] : memref<1x32x256xf32, #tpu.memory_space<vmem>>, vector<1x32x256xf32>
      %29 = vector.shape_cast %28 : vector<1x32x256xf32> to vector<32x256xf32>
      %c0_13 = arith.constant 0 : index
      %30 = memref.load %arg5[%c0_13] : memref<1xf32, #tpu.memory_space<smem>>
      %c0_14 = arith.constant 0 : index
      %c0_15 = arith.constant 0 : index
      %31 = vector.load %arg8[%c0_14, %c0_15] : memref<32x256xf32, #tpu.memory_space<vmem>>, vector<32x256xf32>
      %32 = vector.broadcast %30 : f32 to vector<32x256xf32>
      %33 = arith.mulf %32, %31 : vector<32x256xf32>
      %34 = arith.addf %33, %29 : vector<32x256xf32>
      %c0_16 = arith.constant 0 : index
      %c0_17 = arith.constant 0 : index
      %c0_18 = arith.constant 0 : index
      %35 = vector.load %arg6[%c0_16, %c0_17, %c0_18] : memref<1x32x256xf32, #tpu.memory_space<vmem>>, vector<1x32x256xf32>
      %36 = vector.shape_cast %35 : vector<1x32x256xf32> to vector<32x256xf32>
      %37 = vector.shape_cast %34 : vector<32x256xf32> to vector<1x32x256xf32>
      tpu.vector_store %arg6[%c0_16, %c0_17, %c0_18], %37 {strides = array<i32>} : memref<1x32x256xf32, #tpu.memory_space<vmem>>, vector<1x32x256xf32>,
    } else {
    }
    return
  }
  func.func @transform_0(%arg0: i32, %arg1: i32) -> (i32, i32, i32) {
    %c0_i32 = arith.constant 0 : i32
    %c0_i32_0 = arith.constant 0 : i32
    %c0_i32_1 = arith.constant 0 : i32
    return %arg0, %c0_i32, %c0_i32_0 : i32, i32, i32
  }
  func.func @transform_1(%arg0: i32, %arg1: i32) -> (i32, i32) {
    %c0_i32 = arith.constant 0 : i32
    %c0_i32_0 = arith.constant 0 : i32
    %c0_i32_1 = arith.constant 0 : i32
    return %c0_i32, %c0_i32_0 : i32, i32
  }
  func.func @transform_2(%arg0: i32, %arg1: i32) -> (i32, i32) {
    %c0_i32 = arith.constant 0 : i32
    %c0_i32_0 = arith.constant 0 : i32
    %c0_i32_1 = arith.constant 0 : i32
    return %c0_i32, %c0_i32_0 : i32, i32
  }
  func.func @transform_3(%arg0: i32, %arg1: i32) -> i32 {
    %c0_i32 = arith.constant 0 : i32
    %c0_i32_0 = arith.constant 0 : i32
    return %c0_i32 : i32
  }
  func.func @transform_4(%arg0: i32, %arg1: i32) -> (i32, i32, i32) {
    %c0_i32 = arith.constant 0 : i32
    %c0_i32_0 = arith.constant 0 : i32
    %c0_i32_1 = arith.constant 0 : i32
    return %arg0, %c0_i32, %c0_i32_0 : i32, i32, i32
  }
}

</mosaic_0001>

<bundles_post_ra>
// kernel: tpu_custom_call.1
= control target key start
LH: loop header
LB: loop body
LE: loop exit
PB: predicated region body
PF: predicated region fallthrough
CT: control target
= control target key end

     0   :  { %s2164_s0 = inlined_call_operand.hbm [shape: f32[2,32,256], index: 0, kind: input, shape index: {}]   ;;  %s2165_s1 = inlined_call_operand.vmem [shape: f32[40,32], index: 1, kind: input, shape index: {}]   ;;  %s2166_s2 = inlined_call_operand.vmem [shape: f32[40,1], index: 2, kind: input, shape index: {}]   ;;  %s2167_s3 = inlined_call_operand.<no memory space> [shape: f32[1], index: 3, kind: input, shape index: {}]   ;;  %s2168_s4 = inlined_call_operand.hbm [shape: f32[2,32,256], index: 4, kind: output, shape index: {}]  }
   0x1   :  { %9 = sst [smem:[#allocation4]] %s2167_s3 }
   0x2   :  { %10 = vsyncpa [#allocation6], 0 }
   0x3   :  { %12 = vsyncpa [#allocation6 + $0x1], 0 }
   0x4   :  { %13 = vsyncpa [#allocation7], 0 }
   0x5   :  { %15 = vsyncpa [#allocation7 + $0x1], 0  ;;  %s1605_s17 = smov 0   ;;  %s1607_s18 = smov 0  }
   0x6   :  { %s1609_s19 = smov 0   ;;  %s1611_s20 = smov 0  }
   0x7   :  { %s1613_s21 = smov 0   ;;  %s1615_s22 = smov 0  }
   0x8   :  { %s1617_s23 = smov 0   ;;  %s1619_s24 = smov 0  }
   0x9 LB: > { %s1167_s3 = sadd.s32 4294967295, %s1566_s24   ;;  %s1168_s25 = sadd.s32 4294967294, %s1566_s24   ;;  %s1566_s24 = sphi %s1619_s24, %s21_s24   ;;  %s1562_s23 = sphi %s1617_s23, %s2184_s23   ;;  %s1558_s22 = sphi %s1615_s22, %s2183_s22   ;;  %s1554_s21 = sphi %s1613_s21, %s2182_s21   ;;  %s1550_s20 = sphi %s1611_s20, %s2181_s20   ;;  %s1546_s19 = sphi %s1609_s19, %s2180_s19   ;;  %s1542_s18 = sphi %s1607_s18, %s2179_s18   ;;  %s1538_s17 = sphi %s1605_s17, %s2178_s17  }
   0xa   : > { %s30_s26 = sadd.s32 1, %s1558_s22  ;;  %s33_s27 = sadd.s32 1, %s1562_s23 }
   0xb   : > { %p31_p0 = scmp.ge.s32.totalorder %s30_s26, 2  ;;  %s40_s28 = sadd.s32 1, %s1546_s19 }
   0xc   : > { %p47_p1 = scmp.ne.s32.totalorder %s1546_s19, %s1542_s18  ;;  %p48_p2 = scmp.eq.s32.totalorder %s1566_s24, 0 }
   0xd   : > { %s2186_s26 = smov (%p31_p0, %s30_s26), 0  ;;  %s2188_s27 = smov (!%p31_p0, %s33_s27), %s1562_s23 }
   0xe   : > { %p1656_p3 = por %p48_p2, %p47_p1  ;;  %p53_p4 = scmp.ne.s32.totalorder %s1542_s18, %s1538_s17 }
   0xf   : > { %p35_p5 = scmp.ge.s32.totalorder %s2188_s27, 2  ;;  %p54_p6 = scmp.eq.s32.totalorder %s1167_s3, 0 }
  0x10   : > { %p140_p7 = scmp.eq.s32.totalorder %s1167_s3, 3  ;;  %p146_p8 = scmp.eq.s32.totalorder %s1168_s25, 3 }
  0x11   : > { %s2190_s27 = smov (%p35_p5, %s2188_s27), 0  ;;  %p1664_p9 = por %p54_p6, %p53_p4 }
  0x12   : > { %p1668_p10 = por %p140_p7, %p47_p1  ;;  %s37_s6 = ssub.s32 %s1562_s23, %s2190_s27 }
  0x13   : > { %p1674_p11 = por %p146_p8, %p53_p4  ;;  %p38_p12 = scmp.eq.s32.totalorder %s37_s6, 0 }
  0x14   : > { %s2172_s5 = scalar_select %p1668_p10, 1, 0 }
  0x15   : > { %s2173_s7 = scalar_select %p1674_p11, 1, 0 }
  0x16   : > { %p1267_p13 = scmp.lt.s32.totalorder %s1566_s24, 4  ;;  %s175_s8 = sand.u32 1, %s1546_s19  }
  0x17   : > { %s1681_s9 = scalar_select %p38_p12, %s1546_s19, %s40_s28  }
  0x18   : > { %s1171_s10 = sshll.u32 %s175_s8, 6  ;;  %s1209_s11 = sshll.u32 %s1562_s23, 10 }
  0x19   : > { %s1687_s14 = scalar_lea.hbm %s2164_s0, %s1209_s11  ;;  %s179_s15 = scalar_lea.vmem [#allocation5], %s1171_s10 }
  0x1a   : > { %s186_s16 = sshll.u32 %s179_s15, 4  ;;  %p1693_p0 = pnand %p1267_p13, %p1656_p3  ;;  %s1689_s16 = int_to_ptr.vmem [resolvable:$true] %s186_s16 }
  0x1b   : > { %s1698_s25 = scalar_lea.sflag [#allocation6], %s175_s8  ;;  %s1438_s28 = scalar_lea.hbm %s1687_s14, 1024 }
  0x1c   : > { %p1439_p2 = scmp.ne.s32.totalorder %s1687_s14, %s1438_s28  ;;  %p1440_p4 = pneg %p1693_p0 }
  0x1d   : > { %s1443_s29 = scalar_lea.hbm %s2164_s0, 2048  ;;  %p1444_p3 = scmp.lt.u32.totalorder %s1687_s14, %s2164_s0 }
  0x1e   : > { %p1441_p5 = pnand %p1440_p4, %p1439_p2  ;;  %p1445_p7 = scmp.lt.u32.totalorder %s1443_s29, %s1438_s28 }
  0x1f   : > { %p1447_p12 = scmp.lt.u32.totalorder %s1438_s28, %s1687_s14 }
  0x20   : > { %p1442_p6 = pneg %p1441_p5  ;;  %p1446_p8 = por %p1445_p7, %p1444_p3 }
  0x22   : > { %p1448_p13 = por %p1447_p12, %p1446_p8 }
  0x24   : > { %p1449_p1 = pnand %p1448_p13, %p1442_p6 }
  0x26   : > { %1452 = shalt.err (!%p1449_p1)
}
  0x27   : > { %s1453_s8 = scalar_lea.vmem %s1689_s16, 1024  ;;  %s1568_s13 = smov [#allocation5]  }
  0x28   : > { %p1454_p2 = scmp.ne.s32.totalorder %s1689_s16, %s1453_s8  ;;  %s1458_s15 = sshll.u32 %s1568_s13, 4  ;;  %s1459_s15 = int_to_ptr.vmem [resolvable:$false] %s1458_s15 }
  0x29   : > { %s1460_s6 = scalar_lea.vmem %s1459_s15, 2048  ;;  %p1461_p10 = scmp.lt.s32.totalorder %s1689_s16, %s1459_s15 }
  0x2a   : > { %p1456_p5 = pnand %p1454_p2, %p1440_p4  ;;  %p1462_p3 = scmp.lt.s32.totalorder %s1460_s6, %s1453_s8 }
  0x2c   : > { %p1457_p11 = pneg %p1456_p5  ;;  %p1463_p7 = por %p1462_p3, %p1461_p10 }
  0x2e   : > { %p1464_p8 = pnand %p1463_p7, %p1457_p11 }
  0x30   : > { %1467 = shalt.err (!%p1464_p8)
}
  0x31   : > { %s1569_s28 = smov 256   ;;  %s1570_s10 = smov 16  }
  0x32   : > { %1262 = dma.hbm_to_vmem [thread:$0]  (!%p1693_p0), %s1687_s14, 1024, %s1689_s16, %s1698_s25, %s1569_s28, %s1569_s28, %s1570_s10  }
  0x33   : > { %p194_p1 = scmp.lt.s32.totalorder %s1566_s24, 5  ;;  %p2175_p4 = scmp.ge.s32.totalorder %s1566_s24, 1 }
  0x35   : > { %p195_p6 = pnand %p2175_p4, %p194_p1 }
  0x36   : > { %s1730_s29 = sand.u32 (!%p195_p6), 1, %s1542_s18  }
  0x37   : > { %198 = sbr.rel (%p195_p6) target bundleno = 1297 (0x511), region = 36  ;;  %s1175_s11 = sshll.u32 (!%p195_p6), %s1730_s29, 6 }
  0x38   : > { %s201_s12 = scalar_lea.sflag (!%p195_p6), [#allocation6], %s1730_s29  ;;  %s1734_s8 = scalar_lea.vmem (!%p195_p6), [#allocation5], %s1175_s11 }
  0x3e   : > { %1529 = dma.done.wait (%p1664_p9), %s201_s12, 1024  }
  0x3f   : > { %1531 = vsyncadd (%p1664_p9), %s201_s12, 4294966272  ;;  %s1740_s14 = scalar_lea.vmem [#allocation8], %s1175_s11  ;;  %p1177_p10 = scmp.ne.s32.totalorder %s1550_s20, 0 }
  0x40   : > { %v234_v0 = vld [vmem:[%s1734_s8 + $0x8] sm:$0xff] (!%p1177_p10)  ;;  %v236_v1 = vld [vmem:[%s1734_s8 + $0x18] sm:$0xff] (!%p1177_p10)  ;;  %v233_v2 = vld [vmem:[%s1734_s8] sm:$0xff] (!%p1177_p10)  ;;  %v1571_v7 = vmov (!%p1177_p10), 0.0   ;;  %v1572_v12 = vmov (!%p1177_p10), 0   ;;  %vm276_vm0 = vcmask (!%p1177_p10), 261120  }
  0x41   : > { %232 = sbr.rel (%p1177_p10) target bundleno = 299 (0x12b), region = 44  ;;  %v1211_v3 = vpack.c.bf16 (!%p1177_p10), %v236_v1, %v234_v0  ;;  %v235_v4 = vld [vmem:[%s1734_s8 + $0x10] sm:$0xff] (!%p1177_p10)  ;;  %v238_v5 = vld [vmem:[%s1734_s8 + $0x28] sm:$0xff] (!%p1177_p10)  ;;  %v240_v6 = vld [vmem:[%s1734_s8 + $0x38] sm:$0xff] (!%p1177_p10)  ;;  %356 = vmatprep.mubr.f32.mxu0 (!%p1177_p10), %v1571_v7  ;;  %397 = vst [vmem:[#allocation3] sm:$0xff] (!%p1177_p10), %v1571_v7  ;;  %374 = vmatprep.mubr.f32.mxu1 (!%p1177_p10), %v1571_v7 }
  0x42   : > { %398 = vst [vmem:[#allocation3 + $0x8] sm:$0xff] (!%p1177_p10), %v1571_v7  ;;  %399 = vst [vmem:[#allocation3 + $0x10] sm:$0xff] (!%p1177_p10), %v1571_v7  ;;  %v1213_v8 = vpack.c.bf16 (!%p1177_p10), %v235_v4, %v233_v2  ;;  %v1215_v9 = vpack.c.bf16 (!%p1177_p10), %v240_v6, %v238_v5  ;;  %v237_v10 = vld [vmem:[%s1734_s8 + $0x20] sm:$0xff] (!%p1177_p10)  ;;  %v239_v11 = vld [vmem:[%s1734_s8 + $0x30] sm:$0xff] (!%p1177_p10)  ;;  %1340 = vset.pattern.permute.xlu0 (!%p1177_p10), %v1572_v12  ;;  %1341 = vset.pattern.permute.xlu1 (!%p1177_p10), %v1572_v12 }
  0x43   : > { %400 = vst [vmem:[#allocation3 + $0x18] sm:$0xff] (!%p1177_p10), %v1571_v7  ;;  %401 = vst [vmem:[#allocation3 + $0x20] sm:$0xff] (!%p1177_p10), %v1571_v7  ;;  %1212 = vmatprep.subr.bf16.mxu0 (!%p1177_p10), %v1211_v3  ;;  %1251 = vmatprep.subr.bf16.mxu1 (!%p1177_p10), %v1211_v3  ;;  %v1217_v13 = vpack.c.bf16 (!%p1177_p10), %v239_v11, %v237_v10  ;;  %v246_v14 = vld [vmem:[%s2166_s2] sm:$0xff] (!%p1177_p10)  ;;  %v248_v15 = vld [vmem:[%s2166_s2 + $0x10] sm:$0xff] (!%p1177_p10) }
  0x44   : > { %402 = vst [vmem:[#allocation3 + $0x28] sm:$0xff] (!%p1177_p10), %v1571_v7  ;;  %403 = vst [vmem:[#allocation3 + $0x30] sm:$0xff] (!%p1177_p10), %v1571_v7  ;;  %1214 = vmatpush1.bf16.msra.mxu0 (!%p1177_p10), %v1213_v8  ;;  %1253 = vmatpush1.bf16.msra.mxu1 (!%p1177_p10), %v1213_v8  ;;  %v247_v16 = vld [vmem:[%s2166_s2 + $0x8] sm:$0xff] (!%p1177_p10)  ;;  %v249_v17 = vld [vmem:[%s2166_s2 + $0x18] sm:$0xff] (!%p1177_p10) }
  0x45   : > { %404 = vst [vmem:[#allocation3 + $0x38] sm:$0xff] (!%p1177_p10), %v1571_v7  ;;  %1216 = vmatprep.subr.bf16.mxu0 (!%p1177_p10), %v1215_v9  ;;  %1252 = vmatprep.subr.bf16.mxu1 (!%p1177_p10), %v1215_v9  ;;  %v241_v18 = vld [vmem:[%s2165_s1] sm:$0xff] (!%p1177_p10)  ;;  %v244_v19 = vld [vmem:[%s2165_s1 + $0x18] sm:$0xff] (!%p1177_p10)  ;;  %v242_v21 = vld [vmem:[%s2165_s1 + $0x8] sm:$0xff] (!%p1177_p10) }
  0x46   : > { %253 = vperm.xlu0 (!%p1177_p10), %1340, %v246_v14   ;;  %263 = vperm.xlu1 (!%p1177_p10), %1341, %v248_v15   ;;  %v250_v20 = vld [vmem:[%s2166_s2 + $0x20] sm:$0xff] (!%p1177_p10)  ;;  %v243_v23 = vld [vmem:[%s2165_s1 + $0x10] sm:$0xff] (!%p1177_p10) }
  0x47   : > { %v245_v22 = vld [vmem:[%s2165_s1 + $0x20] sm:$0xff] (!%p1177_p10) }
  0x48   : > { %1218 = vmatpush1.bf16.msra.mxu0 %v1217_v13  ;;  %1254 = vmatpush1.bf16.msra.mxu1 %v1217_v13 }
  0x4a   : > { %258 = vperm.xlu0 %1340, %v247_v16   ;;  %268 = vperm.xlu1 %1341, %v249_v17  }
  0x4b   : > { %1178 = vmatmul.mubr.msk.f32.vlgmr.msra.gmra.mrb[0].mxu0 %vm276_vm0, %v241_v18  ;;  %1181 = vmatmul.mubr.msk.f32.vlgmr.msra.gmra.mrb[0].mxu1 %vm276_vm0, %v244_v19 }
  0x4c   : > { %362 = vmatprep.mubr.f32.mxu0 %v1571_v7  ;;  %380 = vmatprep.mubr.f32.mxu1 %v1571_v7 }
  0x4e   : > { %273 = vperm.xlu0 %1340, %v250_v20  }
  0x4f   : > { %1179 = vmatmul.mubr.msk.f32.gmra.mrb[2].mxu0 %vm276_vm0, %v242_v21  ;;  %1182 = vmatmul.mubr.msk.f32.gmra.mrb[2].mxu1 %vm276_vm0, %v245_v22 }
  0x50   : > { %368 = vmatprep.mubr.f32.mxu0 %v1571_v7 }
  0x53   : > { %1180 = vmatmul.mubr.msk.f32.gmra.mrb[4].mxu0 %vm276_vm0, %v243_v23 }
  0xc5   : > { %v254_v24 = vpop.permute.xlu0 %253  ;;  %v264_v25 = vpop.permute.xlu1 %263 }
  0xc9   : > { %v259_v26 = vpop.permute.xlu0 %258  ;;  %v269_v27 = vpop.permute.xlu1 %268 }
  0xcd   : > { %v274_v36 = vpop.permute.xlu0 %273 }
 0x11e   : > { %v358_v28 = vpop.f32.mrb[0].mxu0  ;;  %v376_v29 = vpop.f32.mrb[0].mxu1 }
 0x11f   : > { %v359_v30 = vadd.f32 %v358_v28, %v254_v24  ;;  %v360_v31 = vpop.f32.mrb[1].mxu0  ;;  %v378_v32 = vpop.f32.mrb[1].mxu1  ;;  %v377_v33 = vadd.f32 %v376_v29, %v269_v27 }
 0x120   : > { %v361_v34 = vadd.f32 %v360_v31, %v254_v24  ;;  %v379_v35 = vadd.f32 %v378_v32, %v269_v27 }
 0x121   : > { %387 = vst [vmem:[#allocation2] sm:$0xff] %v359_v30  ;;  %393 = vst [vmem:[#allocation2 + $0x30] sm:$0xff] %v377_v33 }
 0x122   : > { %388 = vst [vmem:[#allocation2 + $0x8] sm:$0xff] %v361_v34  ;;  %394 = vst [vmem:[#allocation2 + $0x38] sm:$0xff] %v379_v35  ;;  %v364_v37 = vpop.f32.mrb[2].mxu0  ;;  %v382_v38 = vpop.f32.mrb[2].mxu1 }
 0x123   : > { %v365_v39 = vadd.f32 %v364_v37, %v259_v26  ;;  %v383_v40 = vadd.f32 %v382_v38, %v274_v36  ;;  %v366_v41 = vpop.f32.mrb[3].mxu0  ;;  %v384_v42 = vpop.f32.mrb[3].mxu1 }
 0x124   : > { %v367_v43 = vadd.f32 %v366_v41, %v259_v26  ;;  %v385_v44 = vadd.f32 %v384_v42, %v274_v36 }
 0x125   : > { %389 = vst [vmem:[#allocation2 + $0x10] sm:$0xff] %v365_v39  ;;  %395 = vst [vmem:[#allocation2 + $0x40] sm:$0xff] %v383_v40 }
 0x126   : > { %390 = vst [vmem:[#allocation2 + $0x18] sm:$0xff] %v367_v43  ;;  %396 = vst [vmem:[#allocation2 + $0x48] sm:$0xff] %v385_v44  ;;  %v370_v45 = vpop.f32.mrb[4].mxu0 }
 0x127   : > { %v371_v46 = vadd.f32 %v370_v45, %v264_v25  ;;  %v372_v47 = vpop.f32.mrb[5].mxu0 }
 0x128   : > { %v373_v48 = vadd.f32 %v372_v47, %v264_v25 }
 0x129   : > { %391 = vst [vmem:[#allocation2 + $0x20] sm:$0xff] %v371_v46 }
 0x12a   : > { %392 = vst [vmem:[#allocation2 + $0x28] sm:$0xff] %v373_v48 }
 0x12b PF: > { %s1183_s11 = sshll.u32 %s1550_s20, 7  ;;  %v412_v49 = vld [vmem:[#allocation2 + $0x8] sm:$0xf0]  ;;  %vm502_vm1 = vcmask 1043456   ;;  %v411_v50 = vld [vmem:[#allocation2] sm:$0xf0] }
 0x12c   : > { %s406_s12 = sshra.s32 %s1183_s11, 7  ;;  %v452_v51 = vrot.slane %v412_v49, 4  ;;  %v451_v52 = vrot.slane %v411_v50, 4  ;;  %v1573_v53 = vmov 0.0   ;;  %vm453_vm2 = vcmask 31744   ;;  %p1203_p9 = scmp.ne.s32.totalorder %s1550_s20, 1 }
 0x12d   : > { %s1184_s30 = sshll.u32 %s406_s12, 3  ;;  %571 = vmatprep.mubr.f32.mxu0 %v1573_v53  ;;  %980 = vmatprep.mubr.f32.mxu1 %v1573_v53  ;;  %s1033_s3 = sld [smem:[#allocation4]] (!%p1203_p9) }
 0x12e   : > { %1185 = vmatprep.subr.msk.mxu0 %vm502_vm1, %v452_v51  ;;  %s1789_s16 = scalar_lea.vmem [#allocation2], %s1184_s30 }
 0x12f   : > { %1186 = vmatpush1.msk.msra.mxu0 %vm502_vm1, %v451_v52 }
 0x131   : > { %v410_v54 = vld [vmem:[%s1789_s16] sm:$0xf] }
 0x132   : > { %417 = vxpose.xlu0.b32.start.end [1/1] (short) %v410_v54, 128 }
 0x1b2   : > { %v433_v55 = vpop.trf.xlu0 }
 0x1b3   : > { %1187 = vmatmul.mubr.msk.f32.vlgmr.msra.gmra.mrb[0].mxu0 %vm453_vm2, %v433_v55 }
 0x1b4   : > { %577 = vmatprep.mubr.f32.mxu0 %v1573_v53 }
 0x1b6   : > { %v434_v56 = vpop.trf.xlu0 }
 0x1b7   : > { %1188 = vmatmul.mubr.msk.f32.gmra.mrb[2].mxu0 %vm453_vm2, %v434_v56 }
 0x1b8   : > { %583 = vmatprep.mubr.f32.mxu0 %v1573_v53 }
 0x1ba   : > { %v435_v57 = vpop.trf.xlu0 }
 0x1bb   : > { %1189 = vmatmul.mubr.msk.f32.gmra.mrb[4].mxu0 %vm453_vm2, %v435_v57 }
 0x1bc   : > { %589 = vmatprep.mubr.f32.mxu0 %v1573_v53 }
 0x1be   : > { %v436_v58 = vpop.trf.xlu0 }
 0x1bf   : > { %1190 = vmatmul.mubr.msk.f32.gmra.mrb[6].mxu0 %vm453_vm2, %v436_v58 }
 0x1c0   : > { %595 = vmatprep.mubr.f32.mxu0 %v1573_v53 }
 0x1c2   : > { %v437_v59 = vpop.trf.xlu0 }
 0x1c3   : > { %1191 = vmatmul.mubr.msk.f32.gmra.mrb[8].mxu0 %vm453_vm2, %v437_v59 }
 0x1c4   : > { %601 = vmatprep.mubr.f32.mxu0 %v1573_v53 }
 0x1c6   : > { %v438_v60 = vpop.trf.xlu0 }
 0x1c7   : > { %1192 = vmatmul.mubr.msk.f32.gmra.mrb[10].mxu0 %vm453_vm2, %v438_v60 }
 0x1c8   : > { %607 = vmatprep.mubr.f32.mxu0 %v1573_v53 }
 0x1ca   : > { %v439_v61 = vpop.trf.xlu0 }
 0x1cb   : > { %1193 = vmatmul.mubr.msk.f32.gmra.mrb[12].mxu0 %vm453_vm2, %v439_v61 }
 0x1cc   : > { %613 = vmatprep.mubr.f32.mxu0 %v1573_v53 }
 0x1ce   : > { %v440_v62 = vpop.trf.xlu0 }
 0x1cf   : > { %1194 = vmatmul.mubr.msk.f32.gmra.mrb[14].mxu0 %vm453_vm2, %v440_v62 }
 0x1d0   : > { %619 = vmatprep.mubr.f32.mxu0 %v1573_v53 }
 0x1d2   : > { %v441_v63 = vpop.trf.xlu0 }
 0x1d3   : > { %1195 = vmatmul.mubr.msk.f32.gmra.mrb[16].mxu0 %vm453_vm2, %v441_v63 }
 0x1d4   : > { %625 = vmatprep.mubr.f32.mxu0 %v1573_v53 }
 0x1d6   : > { %v442_v0 = vpop.trf.xlu0 }
 0x1d7   : > { %1196 = vmatmul.mubr.msk.f32.gmra.mrb[18].mxu0 %vm453_vm2, %v442_v0 }
 0x1d8   : > { %631 = vmatprep.mubr.f32.mxu0 %v1573_v53 }
 0x1da   : > { %v443_v1 = vpop.trf.xlu0 }
 0x1db   : > { %1197 = vmatmul.mubr.msk.f32.gmra.mrb[20].mxu0 %vm453_vm2, %v443_v1 }
 0x1dc   : > { %637 = vmatprep.mubr.f32.mxu0 %v1573_v53 }
 0x1de   : > { %v444_v2 = vpop.trf.xlu0 }
 0x1df   : > { %1198 = vmatmul.mubr.msk.f32.gmra.mrb[22].mxu0 %vm453_vm2, %v444_v2 }
 0x1e0   : > { %643 = vmatprep.mubr.f32.mxu0 %v1573_v53 }
 0x1e2   : > { %v445_v3 = vpop.trf.xlu0 }
 0x1e3   : > { %1199 = vmatmul.mubr.msk.f32.gmra.mrb[24].mxu0 %vm453_vm2, %v445_v3 }
 0x1e4   : > { %649 = vmatprep.mubr.f32.mxu0 %v1573_v53 }
 0x1e6   : > { %v446_v4 = vpop.trf.xlu0 }
 0x1e7   : > { %1200 = vmatmul.mubr.msk.f32.gmra.mrb[26].mxu0 %vm453_vm2, %v446_v4 }
 0x1e8   : > { %655 = vmatprep.mubr.f32.mxu0 %v1573_v53 }
 0x1ea   : > { %v447_v5 = vpop.trf.xlu0 }
 0x1eb   : > { %1201 = vmatmul.mubr.msk.f32.gmra.mrb[28].mxu0 %vm453_vm2, %v447_v5 }
 0x1ec   : > { %661 = vmatprep.mubr.f32.mxu0 %v1573_v53 }
 0x1ee   : > { %v448_v6 = vpop.trf.xlu0 }
 0x1ef   : > { %1202 = vmatmul.mubr.msk.f32.gmra.mrb[30].mxu0 %vm453_vm2, %v448_v6 }
 0x286   : > { %v1823_v7 = vpop.f32.mrb[0].mxu0 }
 0x287   : > { %v1825_v8 = vpop.f32.mrb[1].mxu0 }
 0x288   : > { %v668_v9 = vmax.f32 %v1823_v7, %v1825_v8 }
 0x28a   : > { %669 = vmax.xlane.f32.xlu0 %v668_v9  ;;  %v1829_v10 = vpop.f32.mrb[2].mxu0 }
 0x28b   : > { %v1831_v11 = vpop.f32.mrb[3].mxu0 }
 0x28c   : > { %v671_v12 = vmax.f32 %v1829_v10, %v1831_v11 }
 0x28e   : > { %672 = vmax.xlane.f32.xlu1 %v671_v12  ;;  %v1835_v13 = vpop.f32.mrb[4].mxu0 }
 0x28f   : > { %v1837_v14 = vpop.f32.mrb[5].mxu0 }
 0x290   : > { %v674_v15 = vmax.f32 %v1835_v13, %v1837_v14 }
 0x292   : > { %675 = vmax.xlane.f32.xlu1 %v674_v15  ;;  %v1841_v16 = vpop.f32.mrb[6].mxu0 }
 0x293   : > { %v1843_v17 = vpop.f32.mrb[7].mxu0 }
 0x294   : > { %v677_v18 = vmax.f32 %v1841_v16, %v1843_v17 }
 0x296   : > { %678 = vmax.xlane.f32.xlu1 %v677_v18  ;;  %v1847_v19 = vpop.f32.mrb[8].mxu0 }
 0x297   : > { %v1849_v20 = vpop.f32.mrb[9].mxu0 }
 0x298   : > { %v680_v21 = vmax.f32 %v1847_v19, %v1849_v20 }
 0x29a   : > { %681 = vmax.xlane.f32.xlu1 %v680_v21  ;;  %v1853_v22 = vpop.f32.mrb[10].mxu0 }
 0x29b   : > { %v1855_v23 = vpop.f32.mrb[11].mxu0 }
 0x29c   : > { %v683_v24 = vmax.f32 %v1853_v22, %v1855_v23 }
 0x29e   : > { %684 = vmax.xlane.f32.xlu1 %v683_v24  ;;  %v1859_v25 = vpop.f32.mrb[12].mxu0 }
 0x29f   : > { %v1861_v26 = vpop.f32.mrb[13].mxu0 }
 0x2a0   : > { %v686_v27 = vmax.f32 %v1859_v25, %v1861_v26 }
 0x2a2   : > { %687 = vmax.xlane.f32.xlu1 %v686_v27  ;;  %v1865_v28 = vpop.f32.mrb[14].mxu0 }
 0x2a3   : > { %v1867_v29 = vpop.f32.mrb[15].mxu0 }
 0x2a4   : > { %v689_v30 = vmax.f32 %v1865_v28, %v1867_v29 }
 0x2a6   : > { %690 = vmax.xlane.f32.xlu1 %v689_v30  ;;  %v1871_v31 = vpop.f32.mrb[16].mxu0 }
 0x2a7   : > { %v1873_v32 = vpop.f32.mrb[17].mxu0 }
 0x2a8   : > { %v692_v33 = vmax.f32 %v1871_v31, %v1873_v32 }
 0x2aa   : > { %693 = vmax.xlane.f32.xlu1 %v692_v33  ;;  %v1877_v34 = vpop.f32.mrb[18].mxu0 }
 0x2ab   : > { %v1879_v35 = vpop.f32.mrb[19].mxu0 }
 0x2ac   : > { %v695_v36 = vmax.f32 %v1877_v34, %v1879_v35 }
 0x2ae   : > { %696 = vmax.xlane.f32.xlu1 %v695_v36  ;;  %v1883_v37 = vpop.f32.mrb[20].mxu0 }
 0x2af   : > { %v1885_v38 = vpop.f32.mrb[21].mxu0 }
 0x2b0   : > { %v698_v39 = vmax.f32 %v1883_v37, %v1885_v38 }
 0x2b2   : > { %699 = vmax.xlane.f32.xlu1 %v698_v39  ;;  %v1889_v40 = vpop.f32.mrb[22].mxu0 }
 0x2b3   : > { %v1891_v41 = vpop.f32.mrb[23].mxu0 }
 0x2b4   : > { %v701_v42 = vmax.f32 %v1889_v40, %v1891_v41 }
 0x2b6   : > { %702 = vmax.xlane.f32.xlu1 %v701_v42  ;;  %v1895_v43 = vpop.f32.mrb[24].mxu0 }
 0x2b7   : > { %v1897_v44 = vpop.f32.mrb[25].mxu0 }
 0x2b8   : > { %v704_v45 = vmax.f32 %v1895_v43, %v1897_v44 }
 0x2ba   : > { %705 = vmax.xlane.f32.xlu1 %v704_v45  ;;  %v1901_v46 = vpop.f32.mrb[26].mxu0 }
 0x2bb   : > { %v1903_v47 = vpop.f32.mrb[27].mxu0 }
 0x2bc   : > { %v707_v48 = vmax.f32 %v1901_v46, %v1903_v47 }
 0x2be   : > { %708 = vmax.xlane.f32.xlu1 %v707_v48  ;;  %v1907_v49 = vpop.f32.mrb[28].mxu0 }
 0x2bf   : > { %v1909_v50 = vpop.f32.mrb[29].mxu0 }
 0x2c0   : > { %v710_v51 = vmax.f32 %v1907_v49, %v1909_v50 }
 0x2c2   : > { %711 = vmax.xlane.f32.xlu1 %v710_v51  ;;  %v1913_v52 = vpop.f32.mrb[30].mxu0 }
 0x2c3   : > { %v1915_v54 = vpop.f32.mrb[31].mxu0 }
 0x2c4   : > { %v713_v55 = vmax.f32 %v1913_v52, %v1915_v54 }
 0x2c6   : > { %714 = vmax.xlane.f32.xlu1 %v713_v55 }
 0x317   : > { %v670_v56 = vpop.xlane.xlu0 %669 }
 0x318   : > { %v716_v57 = vsub.f32 %v1823_v7, %v670_v56  ;;  %v717_v58 = vsub.f32 %v1825_v8, %v670_v56 }
 0x31a   : > { %v748_v59 = vmul.f32 1.442695, %v716_v57  ;;  %v750_v60 = vmul.f32 1.442695, %v717_v58 }
 0x31b   : > { %v673_v61 = vpop.xlane.xlu1 %672 }
 0x31c   : > { %1342 = vpow2.f32 %v748_v59  ;;  %v718_v62 = vsub.f32 %v1829_v10, %v673_v61  ;;  %v719_v63 = vsub.f32 %v1831_v11, %v673_v61 }
 0x31d   : > { %1344 = vpow2.f32 %v750_v60 }
 0x31e   : > { %v752_v0 = vmul.f32 1.442695, %v718_v62  ;;  %v754_v1 = vmul.f32 1.442695, %v719_v63 }
 0x31f   : > { %v676_v2 = vpop.xlane.xlu1 %675 }
 0x320   : > { %1346 = vpow2.f32 %v752_v0  ;;  %v720_v3 = vsub.f32 %v1835_v13, %v676_v2  ;;  %v721_v4 = vsub.f32 %v1837_v14, %v676_v2 }
 0x321   : > { %1348 = vpow2.f32 %v754_v1 }
 0x322   : > { %v756_v5 = vmul.f32 1.442695, %v720_v3  ;;  %v758_v6 = vmul.f32 1.442695, %v721_v4 }
 0x323   : > { %v679_v7 = vpop.xlane.xlu1 %678 }
 0x324   : > { %1350 = vpow2.f32 %v756_v5  ;;  %v722_v8 = vsub.f32 %v1841_v16, %v679_v7  ;;  %v723_v9 = vsub.f32 %v1843_v17, %v679_v7 }
 0x325   : > { %1352 = vpow2.f32 %v758_v6 }
 0x326   : > { %v1927_v10 = vpop.eup %1342  ;;  %v760_v11 = vmul.f32 1.442695, %v722_v8  ;;  %v762_v12 = vmul.f32 1.442695, %v723_v9 }
 0x327   : > { %v1929_v15 = vpop.eup %1344  ;;  %v682_v18 = vpop.xlane.xlu1 %681 }
 0x328   : > { %1354 = vpow2.f32 %v760_v11  ;;  %v724_v13 = vsub.f32 %v1847_v19, %v682_v18  ;;  %v725_v14 = vsub.f32 %v1849_v20, %v682_v18  ;;  %v812_v21 = vadd.f32 %v1929_v15, %v1927_v10 }
 0x329   : > { %1356 = vpow2.f32 %v762_v12 }
 0x32a   : > { %v1935_v16 = vpop.eup %1346  ;;  %v764_v17 = vmul.f32 1.442695, %v724_v13  ;;  %v766_v24 = vmul.f32 1.442695, %v725_v14  ;;  %813 = vadd.xlane.f32.xlu1 %v812_v21 }
 0x32b   : > { %v1937_v27 = vpop.eup %1348  ;;  %v685_v30 = vpop.xlane.xlu1 %684 }
 0x32c   : > { %1358 = vpow2.f32 %v764_v17  ;;  %v726_v33 = vsub.f32 %v1853_v22, %v685_v30  ;;  %v727_v36 = vsub.f32 %v1855_v23, %v685_v30  ;;  %v815_v19 = vadd.f32 %v1937_v27, %v1935_v16 }
 0x32d   : > { %1360 = vpow2.f32 %v766_v24 }
 0x32e   : > { %v1943_v20 = vpop.eup %1350  ;;  %v768_v39 = vmul.f32 1.442695, %v726_v33  ;;  %v770_v42 = vmul.f32 1.442695, %v727_v36  ;;  %816 = vadd.xlane.f32.xlu1 %v815_v19 }
 0x32f   : > { %v1945_v45 = vpop.eup %1352  ;;  %v688_v48 = vpop.xlane.xlu1 %687 }
 0x330   : > { %1362 = vpow2.f32 %v768_v39  ;;  %v728_v51 = vsub.f32 %v1859_v25, %v688_v48  ;;  %v729_v55 = vsub.f32 %v1861_v26, %v688_v48  ;;  %v818_v22 = vadd.f32 %v1945_v45, %v1943_v20 }
 0x331   : > { %1364 = vpow2.f32 %v770_v42 }
 0x332   : > { %v1951_v23 = vpop.eup %1354  ;;  %v772_v56 = vmul.f32 1.442695, %v728_v51  ;;  %v774_v57 = vmul.f32 1.442695, %v729_v55  ;;  %819 = vadd.xlane.f32.xlu1 %v818_v22 }
 0x333   : > { %v1953_v58 = vpop.eup %1356  ;;  %v691_v59 = vpop.xlane.xlu1 %690 }
 0x334   : > { %1366 = vpow2.f32 %v772_v56  ;;  %v730_v60 = vsub.f32 %v1865_v28, %v691_v59  ;;  %v731_v61 = vsub.f32 %v1867_v29, %v691_v59  ;;  %v821_v25 = vadd.f32 %v1953_v58, %v1951_v23 }
 0x335   : > { %1368 = vpow2.f32 %v774_v57 }
 0x336   : > { %v1959_v26 = vpop.eup %1358  ;;  %v776_v62 = vmul.f32 1.442695, %v730_v60  ;;  %v778_v63 = vmul.f32 1.442695, %v731_v61  ;;  %822 = vadd.xlane.f32.xlu1 %v821_v25 }
 0x337   : > { %v1961_v0 = vpop.eup %1360  ;;  %v694_v1 = vpop.xlane.xlu1 %693 }
 0x338   : > { %1370 = vpow2.f32 %v776_v62  ;;  %v732_v2 = vsub.f32 %v1871_v31, %v694_v1  ;;  %v733_v3 = vsub.f32 %v1873_v32, %v694_v1  ;;  %v824_v28 = vadd.f32 %v1961_v0, %v1959_v26 }
 0x339   : > { %1372 = vpow2.f32 %v778_v63 }
 0x33a   : > { %v1967_v29 = vpop.eup %1362  ;;  %v780_v4 = vmul.f32 1.442695, %v732_v2  ;;  %v782_v5 = vmul.f32 1.442695, %v733_v3  ;;  %825 = vadd.xlane.f32.xlu1 %v824_v28 }
 0x33b   : > { %v1969_v6 = vpop.eup %1364  ;;  %v697_v7 = vpop.xlane.xlu1 %696 }
 0x33c   : > { %1374 = vpow2.f32 %v780_v4  ;;  %v734_v8 = vsub.f32 %v1877_v34, %v697_v7  ;;  %v735_v9 = vsub.f32 %v1879_v35, %v697_v7  ;;  %v827_v31 = vadd.f32 %v1969_v6, %v1967_v29 }
 0x33d   : > { %1376 = vpow2.f32 %v782_v5 }
 0x33e   : > { %v1975_v32 = vpop.eup %1366  ;;  %v784_v11 = vmul.f32 1.442695, %v734_v8  ;;  %v786_v12 = vmul.f32 1.442695, %v735_v9  ;;  %828 = vadd.xlane.f32.xlu1 %v827_v31 }
 0x33f   : > { %v1977_v18 = vpop.eup %1368  ;;  %v700_v13 = vpop.xlane.xlu1 %699 }
 0x340   : > { %1378 = vpow2.f32 %v784_v11  ;;  %v736_v14 = vsub.f32 %v1883_v37, %v700_v13  ;;  %v737_v21 = vsub.f32 %v1885_v38, %v700_v13  ;;  %v830_v34 = vadd.f32 %v1977_v18, %v1975_v32 }
 0x341   : > { %1380 = vpow2.f32 %v786_v12 }
 0x342   : > { %v1983_v35 = vpop.eup %1370  ;;  %v788_v17 = vmul.f32 1.442695, %v736_v14  ;;  %v790_v24 = vmul.f32 1.442695, %v737_v21  ;;  %831 = vadd.xlane.f32.xlu1 %v830_v34 }
 0x343   : > { %v1985_v30 = vpop.eup %1372  ;;  %v703_v33 = vpop.xlane.xlu1 %702 }
 0x344   : > { %1382 = vpow2.f32 %v788_v17  ;;  %v738_v36 = vsub.f32 %v1889_v40, %v703_v33  ;;  %v739_v19 = vsub.f32 %v1891_v41, %v703_v33  ;;  %v833_v37 = vadd.f32 %v1985_v30, %v1983_v35 }
 0x345   : > { %1384 = vpow2.f32 %v790_v24 }
 0x346   : > { %v1991_v38 = vpop.eup %1374  ;;  %v792_v39 = vmul.f32 1.442695, %v738_v36  ;;  %v794_v42 = vmul.f32 1.442695, %v739_v19  ;;  %834 = vadd.xlane.f32.xlu1 %v833_v37 }
 0x347   : > { %v1993_v48 = vpop.eup %1376  ;;  %v706_v51 = vpop.xlane.xlu1 %705 }
 0x348   : > { %1386 = vpow2.f32 %v792_v39  ;;  %v740_v55 = vsub.f32 %v1895_v43, %v706_v51  ;;  %v741_v22 = vsub.f32 %v1897_v44, %v706_v51  ;;  %v836_v40 = vadd.f32 %v1993_v48, %v1991_v38 }
 0x349   : > { %1388 = vpow2.f32 %v794_v42 }
 0x34a   : > { %v1999_v41 = vpop.eup %1378  ;;  %v796_v56 = vmul.f32 1.442695, %v740_v55  ;;  %v798_v57 = vmul.f32 1.442695, %v741_v22  ;;  %837 = vadd.xlane.f32.xlu1 %v836_v40 }
 0x34b   : > { %v2001_v59 = vpop.eup %1380  ;;  %v709_v60 = vpop.xlane.xlu1 %708 }
 0x34c   : > { %1390 = vpow2.f32 %v796_v56  ;;  %v742_v61 = vsub.f32 %v1901_v46, %v709_v60  ;;  %v743_v25 = vsub.f32 %v1903_v47, %v709_v60  ;;  %v839_v43 = vadd.f32 %v2001_v59, %v1999_v41 }
 0x34d   : > { %1392 = vpow2.f32 %v798_v57 }
 0x34e   : > { %v2007_v44 = vpop.eup %1382  ;;  %v800_v62 = vmul.f32 1.442695, %v742_v61  ;;  %v802_v63 = vmul.f32 1.442695, %v743_v25  ;;  %840 = vadd.xlane.f32.xlu1 %v839_v43 }
 0x34f   : > { %v2009_v1 = vpop.eup %1384  ;;  %v712_v2 = vpop.xlane.xlu1 %711 }
 0x350   : > { %1394 = vpow2.f32 %v800_v62  ;;  %v744_v3 = vsub.f32 %v1907_v49, %v712_v2  ;;  %v745_v28 = vsub.f32 %v1909_v50, %v712_v2  ;;  %v842_v46 = vadd.f32 %v2009_v1, %v2007_v44 }
 0x351   : > { %1396 = vpow2.f32 %v802_v63 }
 0x352   : > { %v2015_v47 = vpop.eup %1386  ;;  %v804_v4 = vmul.f32 1.442695, %v744_v3  ;;  %v806_v5 = vmul.f32 1.442695, %v745_v28  ;;  %843 = vadd.xlane.f32.xlu1 %v842_v46 }
 0x353   : > { %v2017_v7 = vpop.eup %1388  ;;  %v715_v8 = vpop.xlane.xlu1 %714 }
 0x354   : > { %1398 = vpow2.f32 %v804_v4  ;;  %v746_v9 = vsub.f32 %v1913_v52, %v715_v8  ;;  %v747_v31 = vsub.f32 %v1915_v54, %v715_v8  ;;  %v845_v49 = vadd.f32 %v2017_v7, %v2015_v47 }
 0x355   : > { %1400 = vpow2.f32 %v806_v5 }
 0x356   : > { %v2023_v50 = vpop.eup %1390  ;;  %v808_v11 = vmul.f32 1.442695, %v746_v9  ;;  %v810_v12 = vmul.f32 1.442695, %v747_v31  ;;  %846 = vadd.xlane.f32.xlu1 %v845_v49 }
 0x357   : > { %v2025_v13 = vpop.eup %1392 }
 0x358   : > { %1402 = vpow2.f32 %v808_v11  ;;  %v848_v14 = vadd.f32 %v2025_v13, %v2023_v50 }
 0x359   : > { %1404 = vpow2.f32 %v810_v12 }
 0x35a   : > { %v2029_v21 = vpop.eup %1394  ;;  %849 = vadd.xlane.f32.xlu1 %v848_v14 }
 0x35b   : > { %v2031_v52 = vpop.eup %1396 }
 0x35c   : > { %v851_v54 = vadd.f32 %v2031_v52, %v2029_v21 }
 0x35e   : > { %v2035_v34 = vpop.eup %1398  ;;  %852 = vadd.xlane.f32.xlu0 %v851_v54 }
 0x35f   : > { %v2037_v17 = vpop.eup %1400 }
 0x360   : > { %v854_v24 = vadd.f32 %v2037_v17, %v2035_v34 }
 0x362   : > { %v2041_v33 = vpop.eup %1402  ;;  %855 = vadd.xlane.f32.xlu1 %v854_v24 }
 0x363   : > { %v2043_v36 = vpop.eup %1404 }
 0x364   : > { %v857_v19 = vadd.f32 %v2043_v36, %v2041_v33 }
 0x366   : > { %858 = vadd.xlane.f32.xlu0 %v857_v19 }
 0x3b7   : > { %v814_v37 = vpop.xlane.xlu1 %813 }
 0x3b8   : > { %1406 = vrcp.f32 %v814_v37 }
 0x3bb   : > { %v817_v39 = vpop.xlane.xlu1 %816 }
 0x3bc   : > { %1408 = vrcp.f32 %v817_v39 }
 0x3bf   : > { %v820_v42 = vpop.xlane.xlu1 %819 }
 0x3c0   : > { %1410 = vrcp.f32 %v820_v42 }
 0x3c2   : > { %v1407_v55 = vpop.eup %1406 }
 0x3c3   : > { %v823_v51 = vpop.xlane.xlu1 %822  ;;  %v877_v56 = vmul.f32 %v1407_v55, %v1929_v15  ;;  %v876_v60 = vmul.f32 %v1407_v55, %v1927_v10 }
 0x3c4   : > { %1412 = vrcp.f32 %v823_v51 }
 0x3c6   : > { %v1409_v22 = vpop.eup %1408 }
 0x3c7   : > { %v826_v40 = vpop.xlane.xlu1 %825  ;;  %v879_v57 = vmul.f32 %v1409_v22, %v1937_v27  ;;  %v878_v61 = vmul.f32 %v1409_v22, %v1935_v16 }
 0x3c8   : > { %1414 = vrcp.f32 %v826_v40 }
 0x3c9   : > { %v1219_v25 = vpack.c.bf16 %v879_v57, %v877_v56  ;;  %v1221_v43 = vpack.c.bf16 %v878_v61, %v876_v60 }
 0x3ca   : > { %v1411_v63 = vpop.eup %1410 }
 0x3cb   : > { %1220 = vmatprep.subr.bf16.mxu1 %v1219_v25  ;;  %v829_v62 = vpop.xlane.xlu1 %828  ;;  %v881_v28 = vmul.f32 %v1411_v63, %v1945_v45  ;;  %v880_v27 = vmul.f32 %v1411_v63, %v1943_v20 }
 0x3cc   : > { %1416 = vrcp.f32 %v829_v62  ;;  %1222 = vmatpush1.bf16.msra.mxu1 %v1221_v43 }
 0x3ce   : > { %v1413_v2 = vpop.eup %1412 }
 0x3cf   : > { %v832_v3 = vpop.xlane.xlu1 %831  ;;  %v883_v15 = vmul.f32 %v1413_v2, %v1953_v58  ;;  %v882_v10 = vmul.f32 %v1413_v2, %v1951_v23 }
 0x3d0   : > { %1418 = vrcp.f32 %v832_v3 }
 0x3d1   : > { %v1223_v46 = vpack.c.bf16 %v883_v15, %v881_v28  ;;  %v1225_v16 = vpack.c.bf16 %v882_v10, %v880_v27 }
 0x3d2   : > { %v1415_v5 = vpop.eup %1414 }
 0x3d3   : > { %1224 = vmatprep.subr.bf16.mxu1 %v1223_v46  ;;  %v835_v4 = vpop.xlane.xlu1 %834  ;;  %v885_v31 = vmul.f32 %v1415_v5, %v1961_v0  ;;  %v884_v58 = vmul.f32 %v1415_v5, %v1959_v26 }
 0x3d4   : > { %1420 = vrcp.f32 %v835_v4  ;;  %1226 = vmatpush1.bf16.msra.mxu1 %v1225_v16  ;;  %v414_v16 = vld [vmem:[%s1789_s16 + $0x20] sm:$0xff] }
 0x3d6   : > { %v1417_v8 = vpop.eup %1416 }
 0x3d7   : > { %v838_v9 = vpop.xlane.xlu1 %837  ;;  %v887_v45 = vmul.f32 %v1417_v8, %v1969_v6  ;;  %v886_v20 = vmul.f32 %v1417_v8, %v1967_v29 }
 0x3d8   : > { %1422 = vrcp.f32 %v838_v9 }
 0x3d9   : > { %v1227_v49 = vpack.c.bf16 %v887_v45, %v885_v31  ;;  %v1229_v23 = vpack.c.bf16 %v886_v20, %v884_v58  ;;  %v910_v31 = vld [vmem:[#allocation3 + $0x10] sm:$0xff]  ;;  %v911_v45 = vld [vmem:[#allocation3 + $0x18] sm:$0xff] }
 0x3da   : > { %v1419_v12 = vpop.eup %1418 }
 0x3db   : > { %1228 = vmatprep.subr.bf16.mxu1 %v1227_v49  ;;  %v841_v11 = vpop.xlane.xlu1 %840  ;;  %v889_v24 = vmul.f32 %v1419_v12, %v1977_v18  ;;  %v888_v6 = vmul.f32 %v1419_v12, %v1975_v32  ;;  %v913_v12 = vld [vmem:[#allocation3 + $0x28] sm:$0xff] }
 0x3dc   : > { %1424 = vrcp.f32 %v841_v11  ;;  %1230 = vmatpush1.bf16.msra.mxu1 %v1229_v23  ;;  %v912_v11 = vld [vmem:[#allocation3 + $0x20] sm:$0xff] }
 0x3de   : > { %v1421_v14 = vpop.eup %1420 }
 0x3df   : > { %v844_v54 = vpop.xlane.xlu1 %843  ;;  %v891_v0 = vmul.f32 %v1421_v14, %v1985_v30  ;;  %v890_v26 = vmul.f32 %v1421_v14, %v1983_v35 }
 0x3e0   : > { %1426 = vrcp.f32 %v844_v54 }
 0x3e1   : > { %v1231_v19 = vpack.c.bf16 %v891_v0, %v889_v24  ;;  %v1233_v29 = vpack.c.bf16 %v890_v26, %v888_v6  ;;  %v914_v0 = vld [vmem:[#allocation3 + $0x30] sm:$0xff]  ;;  %v915_v6 = vld [vmem:[#allocation3 + $0x38] sm:$0xff] }
 0x3e2   : > { %v1423_v39 = vpop.eup %1422 }
 0x3e3   : > { %1232 = vmatprep.subr.bf16.mxu1 %v1231_v19  ;;  %v847_v37 = vpop.xlane.xlu1 %846  ;;  %v893_v55 = vmul.f32 %v1423_v39, %v1993_v48  ;;  %v892_v30 = vmul.f32 %v1423_v39, %v1991_v38 }
 0x3e4   : > { %1428 = vrcp.f32 %v847_v37  ;;  %1234 = vmatpush1.bf16.msra.mxu1 %v1233_v29 }
 0x3e6   : > { %v1425_v42 = vpop.eup %1424 }
 0x3e7   : > { %v850_v51 = vpop.xlane.xlu1 %849  ;;  %v895_v18 = vmul.f32 %v1425_v42, %v2001_v59  ;;  %v894_v32 = vmul.f32 %v1425_v42, %v1999_v41 }
 0x3e8   : > { %1430 = vrcp.f32 %v850_v51  ;;  %v1025_v51 = vld [vmem:[%s1734_s8] sm:$0xff] (!%p1203_p9) }
 0x3e9   : > { %v1235_v22 = vpack.c.bf16 %v895_v18, %v893_v55  ;;  %v1237_v35 = vpack.c.bf16 %v894_v32, %v892_v30  ;;  %v1026_v55 = vld [vmem:[%s1734_s8 + $0x8] sm:$0xff] (!%p1203_p9) }
 0x3ea   : > { %v1427_v56 = vpop.eup %1426 }
 0x3eb   : > { %1236 = vmatprep.subr.bf16.mxu1 %v1235_v22  ;;  %v853_v40 = vpop.xlane.xlu0 %852  ;;  %v897_v61 = vmul.f32 %v1427_v56, %v2009_v1  ;;  %v896_v59 = vmul.f32 %v1427_v56, %v2007_v44  ;;  %v1042_v56 = vstv (!%p1203_p9), %s1033_s3 }
 0x3ec   : > { %1432 = vrcp.f32 %v853_v40  ;;  %1238 = vmatpush1.bf16.msra.mxu1 %v1237_v35 }
 0x3ee   : > { %v1429_v57 = vpop.eup %1428 }
 0x3ef   : > { %v856_v60 = vpop.xlane.xlu1 %855  ;;  %v899_v48 = vmul.f32 %v1429_v57, %v2017_v7  ;;  %v898_v38 = vmul.f32 %v1429_v57, %v2015_v47  ;;  %v1027_v57 = vld [vmem:[%s1734_s8 + $0x10] sm:$0xff] (!%p1203_p9) }
 0x3f0   : > { %1434 = vrcp.f32 %v856_v60  ;;  %v1028_v60 = vld [vmem:[%s1734_s8 + $0x18] sm:$0xff] (!%p1203_p9) }
 0x3f1   : > { %v1239_v25 = vpack.c.bf16 %v899_v48, %v897_v61  ;;  %v1241_v41 = vpack.c.bf16 %v898_v38, %v896_v59  ;;  %v1029_v61 = vld [vmem:[%s1734_s8 + $0x20] sm:$0xff] (!%p1203_p9) }
 0x3f2   : > { %v1431_v62 = vpop.eup %1430 }
 0x3f3   : > { %1240 = vmatprep.subr.bf16.mxu1 %v1239_v25  ;;  %v859_v43 = vpop.xlane.xlu0 %858  ;;  %v901_v2 = vmul.f32 %v1431_v62, %v2025_v13  ;;  %v900_v1 = vmul.f32 %v1431_v62, %v2023_v50  ;;  %v1032_v62 = vld [vmem:[%s1734_s8 + $0x38] sm:$0xff] (!%p1203_p9) }
 0x3f4   : > { %1436 = vrcp.f32 %v859_v43  ;;  %1242 = vmatpush1.bf16.msra.mxu1 %v1241_v41  ;;  %v1030_v41 = vld [vmem:[%s1734_s8 + $0x28] sm:$0xff] (!%p1203_p9)  ;;  %v1031_v43 = vld [vmem:[%s1734_s8 + $0x30] sm:$0xff] (!%p1203_p9) }
 0x3f6   : > { %v1433_v63 = vpop.eup %1432 }
 0x3f7   : > { %v903_v3 = vmul.f32 %v1433_v63, %v2031_v52  ;;  %v902_v44 = vmul.f32 %v1433_v63, %v2029_v21  ;;  %v413_v21 = vld [vmem:[%s1789_s16 + $0x10] sm:$0xff] }
 0x3f9   : > { %v1243_v7 = vpack.c.bf16 %v903_v3, %v901_v2  ;;  %v1245_v47 = vpack.c.bf16 %v902_v44, %v900_v1 }
 0x3fa   : > { %v1435_v28 = vpop.eup %1434 }
 0x3fb   : > { %1244 = vmatprep.subr.bf16.mxu1 %v1243_v7  ;;  %v905_v27 = vmul.f32 %v1435_v28, %v2037_v17  ;;  %v904_v13 = vmul.f32 %v1435_v28, %v2035_v34  ;;  %v415_v17 = vld [vmem:[%s1789_s16 + $0x30] sm:$0xff] }
 0x3fc   : > { %1246 = vmatpush1.bf16.msra.mxu1 %v1245_v47  ;;  %v908_v34 = vld [vmem:[#allocation3] sm:$0xff] }
 0x3fe   : > { %v1437_v15 = vpop.eup %1436 }
 0x3ff   : > { %v907_v10 = vmul.f32 %v1437_v15, %v2043_v36  ;;  %v906_v50 = vmul.f32 %v1437_v15, %v2041_v33  ;;  %v416_v36 = vld [vmem:[%s1789_s16 + $0x40] sm:$0xff]  ;;  %v909_v33 = vld [vmem:[#allocation3 + $0x8] sm:$0xff] }
 0x401   : > { %v1247_v52 = vpack.c.bf16 %v907_v10, %v905_v27  ;;  %v1249_v46 = vpack.c.bf16 %v906_v50, %v904_v13 }
 0x403   : > { %1248 = vmatprep.subr.bf16.mxu1 %v1247_v52 }
 0x404   : > { %1250 = vmatpush1.bf16.msra.mxu1 %v1249_v46 }
 0x407   : > { %981 = vmatmul.mubr.f32.vlgmr.msra.gmra.mrb[0].mxu1 %v413_v21 }
 0x408   : > { %986 = vmatprep.mubr.f32.mxu1 %v1573_v53 }
 0x40b   : > { %987 = vmatmul.mubr.f32.gmra.mrb[2].mxu1 %v414_v16 }
 0x40c   : > { %992 = vmatprep.mubr.f32.mxu1 %v1573_v53 }
 0x40f   : > { %993 = vmatmul.mubr.f32.gmra.mrb[4].mxu1 %v415_v17 }
 0x410   : > { %998 = vmatprep.mubr.f32.mxu1 %v1573_v53 }
 0x413   : > { %999 = vmatmul.mubr.f32.gmra.mrb[6].mxu1 %v416_v36 }
 0x4da   : > { %v982_v4 = vpop.f32.mrb[0].mxu1 }
 0x4db   : > { %v1005_v5 = vadd.f32 %v982_v4, %v908_v34  ;;  %v984_v8 = vpop.f32.mrb[1].mxu1 }
 0x4dc   : > { %v1006_v9 = vadd.f32 %v984_v8, %v909_v33 }
 0x4dd   : > { %1013 = vst [vmem:[#allocation3] sm:$0xff] %v1005_v5 }
 0x4de   : > { %1014 = vst [vmem:[#allocation3 + $0x8] sm:$0xff] %v1006_v9  ;;  %v988_v58 = vpop.f32.mrb[2].mxu1 }
 0x4df   : > { %v1007_v20 = vadd.f32 %v988_v58, %v910_v31  ;;  %v990_v49 = vpop.f32.mrb[3].mxu1 }
 0x4e0   : > { %v1008_v23 = vadd.f32 %v990_v49, %v911_v45 }
 0x4e1   : > { %1015 = vst [vmem:[#allocation3 + $0x10] sm:$0xff] %v1007_v20 }
 0x4e2   : > { %1016 = vst [vmem:[#allocation3 + $0x18] sm:$0xff] %v1008_v23  ;;  %v994_v53 = vpop.f32.mrb[4].mxu1 }
 0x4e3   : > { %v1009_v14 = vadd.f32 %v994_v53, %v912_v11  ;;  %v996_v54 = vpop.f32.mrb[5].mxu1 }
 0x4e4   : > { %v1010_v24 = vadd.f32 %v996_v54, %v913_v12  ;;  %1024 = sbr.rel (%p1203_p9) target bundleno = 1271 (0x4f7), region = 48  ;;  %v1034_v39 = vld [vmem:[#allocation3] sm:$0xff] (!%p1203_p9) }
 0x4e5   : > { %1017 = vst [vmem:[#allocation3 + $0x20] sm:$0xff] %v1009_v14  ;;  %v1035_v42 = vld [vmem:[#allocation3 + $0x8] sm:$0xff] (!%p1203_p9)  ;;  %v1043_v48 = vmul.f32 (!%p1203_p9), %v1042_v56, %v1034_v39 }
 0x4e6   : > { %1018 = vst [vmem:[#allocation3 + $0x28] sm:$0xff] %v1010_v24  ;;  %v1000_v26 = vpop.f32.mrb[6].mxu1  ;;  %v1044_v59 = vmul.f32 (!%p1203_p9), %v1042_v56, %v1035_v42 }
 0x4e7   : > { %v1011_v19 = vadd.f32 %v1000_v26, %v914_v0  ;;  %v1002_v29 = vpop.f32.mrb[7].mxu1  ;;  %v1051_v44 = vadd.f32 (!%p1203_p9), %v1043_v48, %v1025_v51 }
 0x4e8   : > { %v1012_v37 = vadd.f32 %v1002_v29, %v915_v6  ;;  %v1036_v18 = vld [vmem:[#allocation3 + $0x10] sm:$0xff] (!%p1203_p9)  ;;  %v1052_v7 = vadd.f32 (!%p1203_p9), %v1044_v59, %v1026_v55 }
 0x4e9   : > { %1019 = vst [vmem:[#allocation3 + $0x30] sm:$0xff] %v1011_v19  ;;  %v1037_v30 = vld [vmem:[#allocation3 + $0x18] sm:$0xff] (!%p1203_p9)  ;;  %v1045_v38 = vmul.f32 (!%p1203_p9), %v1042_v56, %v1036_v18  ;;  %1059 = vst [vmem:[%s1740_s14] sm:$0xff] (!%p1203_p9), %v1051_v44 }
 0x4ea   : > { %1020 = vst [vmem:[#allocation3 + $0x38] sm:$0xff] %v1012_v37  ;;  %v1046_v25 = vmul.f32 (!%p1203_p9), %v1042_v56, %v1037_v30  ;;  %1060 = vst [vmem:[%s1740_s14 + $0x8] sm:$0xff] (!%p1203_p9), %v1052_v7 }
 0x4eb   : > { %v1053_v47 = vadd.f32 %v1045_v38, %v1027_v57 }
 0x4ec   : > { %v1038_v32 = vld [vmem:[#allocation3 + $0x20] sm:$0xff]  ;;  %v1054_v28 = vadd.f32 %v1046_v25, %v1028_v60 }
 0x4ed   : > { %v1039_v22 = vld [vmem:[#allocation3 + $0x28] sm:$0xff]  ;;  %v1047_v63 = vmul.f32 %v1042_v56, %v1038_v32  ;;  %1061 = vst [vmem:[%s1740_s14 + $0x10] sm:$0xff] %v1053_v47 }
 0x4ee   : > { %v1048_v2 = vmul.f32 %v1042_v56, %v1039_v22  ;;  %1062 = vst [vmem:[%s1740_s14 + $0x18] sm:$0xff] %v1054_v28 }
 0x4ef   : > { %v1055_v15 = vadd.f32 %v1047_v63, %v1029_v61 }
 0x4f0   : > { %v1040_v35 = vld [vmem:[#allocation3 + $0x30] sm:$0xff]  ;;  %v1056_v27 = vadd.f32 %v1048_v2, %v1030_v41 }
 0x4f1   : > { %v1041_v40 = vld [vmem:[#allocation3 + $0x38] sm:$0xff]  ;;  %v1049_v3 = vmul.f32 %v1042_v56, %v1040_v35  ;;  %1063 = vst [vmem:[%s1740_s14 + $0x20] sm:$0xff] %v1055_v15 }
 0x4f2   : > { %v1050_v1 = vmul.f32 %v1042_v56, %v1041_v40  ;;  %1064 = vst [vmem:[%s1740_s14 + $0x28] sm:$0xff] %v1056_v27 }
 0x4f3   : > { %v1057_v10 = vadd.f32 %v1049_v3, %v1031_v43 }
 0x4f4   : > { %v1058_v13 = vadd.f32 %v1050_v1, %v1032_v62 }
 0x4f5   : > { %1065 = vst [vmem:[%s1740_s14 + $0x30] sm:$0xff] %v1057_v10 }
 0x4f6   : > { %1066 = vst [vmem:[%s1740_s14 + $0x38] sm:$0xff] %v1058_v13 }
 0x4f7 PF: > { %s1210_s20 = sshll.u32 %s1554_s21, 10  ;;  %s1081_s15 = sshll.u32 %s1740_s14, 4  ;;  %s2110_s15 = int_to_ptr.vmem [resolvable:$true] %s1081_s15 }
 0x4f8   : > { %s2107_s13 = scalar_lea.hbm %s2168_s4, %s1210_s20  ;;  %s1068_s6 = scalar_lea.sflag [#allocation7], %s1730_s29 }
 0x4f9   : > { %s1468_s28 = scalar_lea.vmem %s2110_s15, 1024  ;;  %p2176_p0 = scmp.ne.s32.totalorder %s2172_s5, 0 }
 0x4fa   : > { %p1469_p11 = scmp.ne.s32.totalorder %s2110_s15, %s1468_s28  ;;  %s1574_s10 = smov [#allocation8]  }
 0x4fb   : > { %s1472_s11 = sshll.u32 %s1574_s10, 4  ;;  %s1473_s11 = int_to_ptr.vmem [resolvable:$false] %s1472_s11 }
 0x4fc   : > { %p1470_p12 = pnand %p1469_p11, %p2176_p0  ;;  %s1474_s21 = scalar_lea.vmem %s1473_s11, 2048 }
 0x4fd   : > { %p1475_p2 = scmp.lt.s32.totalorder %s2110_s15, %s1473_s11  ;;  %p1476_p5 = scmp.lt.s32.totalorder %s1474_s21, %s1468_s28 }
 0x4fe   : > { %p1471_p13 = pneg %p1470_p12 }
 0x4ff   : > { %p1477_p3 = por %p1476_p5, %p1475_p2 }
 0x501   : > { %p1478_p7 = pnand %p1477_p3, %p1471_p13 }
 0x503   : > { %1481 = shalt.err (!%p1478_p7)
}
 0x504   : > { %s1482_s14 = scalar_lea.hbm %s2107_s13, 1024  ;;  %s1486_s16 = scalar_lea.hbm %s2168_s4, 2048 }
 0x505   : > { %p1483_p8 = scmp.ne.s32.totalorder %s2107_s13, %s1482_s14  ;;  %p1487_p6 = scmp.lt.u32.totalorder %s2107_s13, %s2168_s4 }
 0x506   : > { %p1488_p10 = scmp.lt.u32.totalorder %s1486_s16, %s1482_s14  ;;  %p1490_p11 = scmp.lt.u32.totalorder %s1482_s14, %s2107_s13 }
 0x507   : > { %p1484_p1 = pnand %p1483_p8, %p2176_p0 }
 0x508   : > { %p1489_p9 = por %p1488_p10, %p1487_p6 }
 0x509   : > { %p1485_p4 = pneg %p1484_p1 }
 0x50a   : > { %p1491_p12 = por %p1490_p11, %p1489_p9 }
 0x50c   : > { %p1492_p13 = pnand %p1491_p12, %p1485_p4 }
 0x50e   : > { %1495 = shalt.err (!%p1492_p13)
}
 0x50f   : > { %s1575_s8 = smov 256   ;;  %s1576_s25 = smov 16  }
 0x510   : > { %1257 = dma.vmem_to_hbm [thread:$0]  (%p2176_p0), %s2110_s15, 1024, %s2107_s13, %s1068_s6, %s1575_s8, %s1575_s8, %s1576_s25  }
 0x511 PF: > { %p1268_p2 = scmp.ge.s32.totalorder %s1566_s24, 2  ;;  %s1096_s28 = sand.u32 1, %s1538_s17  }
 0x512   : > { %p2177_p5 = scmp.ne.s32.totalorder %s2173_s7, 0  ;;  %s1097_s10 = scalar_lea.sflag [#allocation7], %s1096_s28 }
 0x514   : > { %p1264_p3 = pnand %p1268_p2, %p2177_p5 }
 0x516   : > { %1533 = dma.done.wait (!%p1264_p3), %s1097_s10, 1024  }
 0x517   : > { %1535 = vsyncadd (!%p1264_p3), %s1097_s10, 4294966272  ;;  %s21_s24 = sadd.s32 1, %s1566_s24   ;;  %s2178_s17 = smov %s1542_s18 }
 0x518   : > { %p18_p7 = scmp.ge.s32.totalorder %s21_s24, 6   ;;  %s2179_s18 = smov %s1546_s19 }
 0x519   : > { %s2180_s19 = smov %s1681_s9  ;;  %s2181_s20 = smov %s1558_s22 }
 0x51a   : > { %s2182_s21 = smov %s1562_s23  ;;  %s2183_s22 = smov %s2186_s26 }
 0x51b   : > { %s2184_s23 = smov %s2190_s27  ;;  %20 = sbr.rel (!%p18_p7) target bundleno = 9 (0x9), region = 90 }
 0x522   :  { %1102 = vsyncpa [#allocation6], 1 }
 0x523   :  { %1104 = vsyncpa [#allocation6 + $0x1], 1 }
 0x524   :  { %1105 = vsyncpa [#allocation7], 1 }
 0x525   :  { %1107 = vsyncpa [#allocation7 + $0x1], 1 }

</bundles_post_ra>
